<compile_context>
chip_gen: v6e
topology: v6e:2x2x1
jax: 0.10.0
libtpu: 0.0.40
codegen_flags: <defaults>
</compile_context>

<pallas_src>
import jax
import jax.numpy as jnp
from jax.experimental import pallas as pl
from jax.experimental.pallas import tpu as pltpu


LANE = 128
MIN_GRID_STEPS = 4                      # >= 2 steps per TensorCore on v7x (2 TCs)
VMEM_TILE_BUDGET = 20 * 1024 * 1024     # stay under v7x's 32 MiB scoped VMEM w/ headroom


def _ceil_to(v, m):
    return -(-v // m) * m


# ----------------------------- Pallas kernel --------------------------------
def _gemm_bias_relu_kernel(xc_ref, w_ref, b_ref, o_ref):
    # xc_ref: (Kp, TM)   bf16  im2col columns for this M-tile (lanes = flat spatial)
    # w_ref : (Cout, Kp) bf16  conv weight as a matrix (resident across the grid)
    # b_ref : (Cout, 1)  f32   bias                    (resident across the grid)
    # o_ref : (Cout, TM) bf16  lane-dense output tile (unmasked 128-lane stores)
    acc = jnp.dot(w_ref[...], xc_ref[...], preferred_element_type=jnp.float32)
    acc = acc + b_ref[...]                          # broadcast (Cout, 1) over lanes
    o_ref[...] = jnp.maximum(acc, 0.0).astype(o_ref.dtype)


# ------------------------------ wrapper --------------------------------------
def conv3d_relu_pallas(x, weight, bias, *, padding, stride, tile_m=8192,
                       out_dtype=jnp.bfloat16):
    """relu(conv3d(x, weight) + bias); x: (N,Cin,D,H,W), weight: (Cout,Cin,ks,ks,ks)."""
    N, Cin, D, H, W = x.shape
    Cout, _, ks, _, _ = weight.shape
    pd, ph, pw = padding
    sd, sh, sw = stride

    Dp, Hp, Wp = D + 2 * pd, H + 2 * ph, W + 2 * pw
    Do = (Dp - ks) // sd + 1
    Ho = (Hp - ks) // sh + 1
    Wo = (Wp - ks) // sw + 1
    K = Cin * ks * ks * ks
    Mo = Do * Ho * Wo
    Mtot = N * Mo

    # ---- glue: zero-pad, cast to bf16 BEFORE the ks^3 expansion, channel-major ----
    xp = jnp.pad(x, ((0, 0), (0, 0), (pd, pd), (ph, ph), (pw, pw)))
    xp = xp.astype(jnp.bfloat16)                 # halve the 27x-expanded traffic
    xp = jnp.transpose(xp, (1, 0, 2, 3, 4))      # small transpose: (Cin, N, Dp, Hp, Wp)
    cols = []
    for kd in range(ks):
        for kh in range(ks):
            for kw in range(ks):
                cols.append(xp[:, :,
                               kd:kd + (Do - 1) * sd + 1:sd,
                               kh:kh + (Ho - 1) * sh + 1:sh,
                               kw:kw + (Wo - 1) * sw + 1:sw])   # (Cin, N, Do, Ho, Wo)
    # (Cin, ks^3, N, Do, Ho, Wo) -> (K, Mtot); K-order (Cin, kd, kh, kw) matches weight,
    # M-order (N, Do, Ho, Wo) row-major -> no transpose of the big expanded tensor.
    xcol = jnp.stack(cols, axis=1).reshape(K, Mtot)
    # TODO(synk): a fully fused im2col (ks^3 grid axis with element-offset index_map)
    # would drop the xcol HBM round-trip entirely; kept as wrapper glue for robustness.

    wmat = weight.reshape(Cout, K).astype(jnp.bfloat16)
    bcol = bias.astype(jnp.float32).reshape(Cout, 1)

    # ---- tiling: pad K for bf16 sublane packing, pick a lane-dense TM -------------
    Kp = _ceil_to(K, 16)
    out_isz = jnp.dtype(out_dtype).itemsize

    # VMEM per lane column: double-buffered bf16 input tile + double-buffered output.
    per_lane = 2 * Kp * 2 + 2 * Cout * out_isz
    resident = 2 * (Cout * Kp * 2 + Cout * 4)           # weight + bias (resident)
    tm_cap = max(LANE, ((VMEM_TILE_BUDGET - resident) // per_lane) // LANE * LANE)

    tm = min(tile_m, tm_cap)
    # keep >= MIN_GRID_STEPS grid steps (>= 2 per TC on v7x) when the problem allows,
    # while leaving TM as large as possible for v5e/v6e step-overhead amortization.
    tm_steps = _ceil_to(max(1, -(-Mtot // MIN_GRID_STEPS)), LANE)
    tm = max(LANE, min(tm, tm_steps, _ceil_to(Mtot, LANE)))
    Mp = _ceil_to(Mtot, tm)
    grid = (Mp // tm,)

    xcol = jnp.pad(xcol, ((0, Kp - K), (0, Mp - Mtot)))
    wmat = jnp.pad(wmat, ((0, 0), (0, Kp - K)))

    # advisory cost estimate: each xcol tile read once; weight/bias resident (once).
    flops = 2 * Cout * Kp * Mp
    bytes_accessed = (Kp * Mp * 2 + Cout * Kp * 2 + Cout * 4 + Cout * Mp * out_isz)

    vmem_need = per_lane * tm + resident
    vmem_limit = int(min(48 * 1024 * 1024,
                         max(16 * 1024 * 1024, vmem_need + 4 * 1024 * 1024)))

    out = pl.pallas_call(
        _gemm_bias_relu_kernel,
        out_shape=jax.ShapeDtypeStruct((Cout, Mp), out_dtype),
        grid_spec=pltpu.PrefetchScalarGridSpec(
            num_scalar_prefetch=0,
            grid=grid,
            in_specs=[
                pl.BlockSpec((Kp, tm), lambda m: (0, m)),      # im2col tile (streamed)
                pl.BlockSpec((Cout, Kp), lambda m: (0, 0)),    # weight (resident)
                pl.BlockSpec((Cout, 1), lambda m: (0, 0)),     # bias   (resident)
            ],
            out_specs=pl.BlockSpec((Cout, tm), lambda m: (0, m)),
        ),
        compiler_params=pltpu.CompilerParams(
            dimension_semantics=("parallel",),
            vmem_limit_bytes=vmem_limit),
        cost_estimate=pl.CostEstimate(flops=int(flops), transcendentals=0,
                                      bytes_accessed=int(bytes_accessed)),
    )(xcol, wmat, bcol)

    # glue: drop M padding, un-flatten back to NCDHW (half the bytes in bf16).
    out = out[:, :Mtot].reshape(Cout, N, Do, Ho, Wo)
    return jnp.transpose(out, (1, 0, 2, 3, 4))


conv3d_relu = jax.jit(conv3d_relu_pallas,
                      static_argnames=("padding", "stride", "tile_m", "out_dtype"))


# ------------------- L2 Lipschitz weight parametrization ---------------------
def l2_lipschitz_constrain(weight, in_size, padding, stride, max_lc, key,
                           n_iter=20):
    """Rescale conv weight so the conv operator's spectral norm <= max_lc."""
    Cin = weight.shape[1]
    D, H, W = in_size
    pads = [(p, p) for p in padding]

    def conv_op(u):
        return jax.lax.conv_general_dilated(
            u, weight, window_strides=stride, padding=pads,
            dimension_numbers=('NCDHW', 'OIDHW', 'NCDHW'))

    u = jax.random.normal(key, (1, Cin, D, H, W), jnp.float32)
    u = u / (jnp.linalg.norm(u) + 1e-12)
    for _ in range(n_iter):
        v = conv_op(u)
        v = v / (jnp.linalg.norm(v) + 1e-12)
        _, vjp_fn = jax.vjp(conv_op, u)
        u = vjp_fn(v)[0]
        u = u / (jnp.linalg.norm(u) + 1e-12)
    sigma = jnp.linalg.norm(conv_op(u))
    scale = jnp.minimum(1.0, max_lc / (sigma + 1e-12))
    return weight * scale


# ------------------------------- reference -----------------------------------
def _ref_conv_relu(x, w, b, padding, stride):
    # reference on the same bf16-rounded inputs, f32 accumulation
    xr = x.astype(jnp.bfloat16).astype(jnp.float32)
    wr = w.astype(jnp.bfloat16).astype(jnp.float32)
    out = jax.lax.conv_general_dilated(
        xr, wr, window_strides=stride, padding=[(p, p) for p in padding],
        dimension_numbers=('NCDHW', 'OIDHW', 'NCDHW'),
        precision=jax.lax.Precision.HIGHEST)
    return jnp.maximum(out + b.reshape(1, -1, 1, 1, 1), 0.0)


# --------------------------------- main ---------------------------------------
if __name__ == "__main__":
    # Module hyperparameters (small, consistent with NetC(in_ch, out_ch, ks, ...))
    in_ch, out_ch = 4, 8
    ks = 3
    padding = (1, 1, 1)
    stride = (1, 1, 1)
    batch = 2
    D, H, W = 8, 16, 16
    in_size = (D, H, W)
    max_lc = 1.0

    key = jax.random.PRNGKey(0)
    k_w, k_b, k_x, k_pi = jax.random.split(key, 4)

    # Deterministic Conv3d parameter init (PyTorch-like uniform bound)
    fan_in = in_ch * ks * ks * ks
    bound = 1.0 / jnp.sqrt(fan_in)
    weight = jax.random.uniform(k_w, (out_ch, in_ch, ks, ks, ks),
                                jnp.float32, -bound, bound)
    bias = jax.random.uniform(k_b, (out_ch,), jnp.float32, -bound, bound)

    # Lipschitz-constrained ("parametrized") weight
    w_lip = l2_lipschitz_constrain(weight, in_size, padding, stride, max_lc, k_pi)

    # Input (PyTorch Conv3d layout: N, C, D, H, W)
    x = jax.random.normal(k_x, (batch, in_ch, D, H, W), jnp.float32)

    # Pallas forward: relu(conv3d(x, w_lip) + bias), bf16 output
    y = conv3d_relu(x, w_lip, bias, padding=padding, stride=stride)
    y = jax.block_until_ready(y)

    ref = _ref_conv_relu(x, w_lip, bias, padding, stride)
    assert y.shape == ref.shape, (y.shape, ref.shape)
    # tolerance accounts for the bf16 output rounding (one ulp ~ 0.4% relative)
    assert jnp.allclose(y.astype(jnp.float32), ref, atol=1e-2, rtol=1e-2), float(
        jnp.max(jnp.abs(y.astype(jnp.float32) - ref)))

    # Extra check: stride handled exactly in the GEMM lowering (no subsample waste).
    stride2 = (2, 2, 2)
    y2 = conv3d_relu(x, w_lip, bias, padding=padding, stride=stride2)
    y2 = jax.block_until_ready(y2)
    ref2 = _ref_conv_relu(x, w_lip, bias, padding, stride2)
    assert y2.shape == ref2.shape, (y2.shape, ref2.shape)
    assert jnp.allclose(y2.astype(jnp.float32), ref2, atol=1e-2, rtol=1e-2), float(
        jnp.max(jnp.abs(y2.astype(jnp.float32) - ref2)))

    print("KERNEL_OK")
</pallas_src>

<mosaic_0001>
module attributes {stable_mosaic.version = 11 : i64} {
  func.func @_gemm_bias_relu_kernel(%arg0: i32, %arg1: memref<112x1024xbf16, #tpu.memory_space<vmem>>, %arg2: memref<8x112xbf16, #tpu.memory_space<vmem>>, %arg3: memref<8x1xf32, #tpu.memory_space<vmem>>, %arg4: memref<8x1024xbf16, #tpu.memory_space<vmem>>) attributes {dimension_semantics = [#tpu.dimension_semantics<parallel>], iteration_bounds = array<i64: 4>, scalar_prefetch = 0 : i64, scratch_operands = 0 : i64, tpu.core_type = #tpu.core_type<tc>, window_params = [{transform_indices = @transform_0, window_bounds = array<i64: 112, 1024>}, {pipeline_mode = #tpu.pipeline_mode<synchronous>, transform_indices = @transform_1, window_bounds = array<i64: 8, 112>}, {pipeline_mode = #tpu.pipeline_mode<synchronous>, transform_indices = @transform_2, window_bounds = array<i64: 8, 1>}, {transform_indices = @transform_3, window_bounds = array<i64: 8, 1024>}]} {
    %c0 = arith.constant 0 : index
    %c0_0 = arith.constant 0 : index
    %0 = vector.load %arg2[%c0, %c0_0] : memref<8x112xbf16, #tpu.memory_space<vmem>>, vector<8x112xbf16>
    %c0_1 = arith.constant 0 : index
    %c0_2 = arith.constant 0 : index
    %1 = vector.load %arg1[%c0_1, %c0_2] : memref<112x1024xbf16, #tpu.memory_space<vmem>>, vector<112x1024xbf16>
    %cst = arith.constant dense<0.000000e+00> : vector<8x1024xf32>
    %2 = tpu.matmul %0, %1, %cst {dimension_numbers = #tpu.dot_dimension_numbers<[1], [0], [0], [1], [0, 0, 1, 1], [], []>} : vector<8x112xbf16>, vector<112x1024xbf16>, vector<8x1024xf32> -> vector<8x1024xf32>
    %c0_3 = arith.constant 0 : index
    %c0_4 = arith.constant 0 : index
    %3 = vector.load %arg3[%c0_3, %c0_4] : memref<8x1xf32, #tpu.memory_space<vmem>>, vector<8x1xf32>
    %4 = vector.broadcast %3 : vector<8x1xf32> to vector<8x1024xf32>
    %5 = arith.addf %2, %4 : vector<8x1024xf32>
    %cst_5 = arith.constant 0.000000e+00 : f32
    %6 = vector.broadcast %cst_5 : f32 to vector<8x1024xf32>
    %7 = arith.maximumf %5, %6 : vector<8x1024xf32>
    %8 = arith.truncf %7 : vector<8x1024xf32> to vector<8x1024xbf16>
    %c0_6 = arith.constant 0 : index
    %c0_7 = arith.constant 0 : index
    %9 = vector.load %arg4[%c0_6, %c0_7] : memref<8x1024xbf16, #tpu.memory_space<vmem>>, vector<8x1024xbf16>
    tpu.vector_store %arg4[%c0_6, %c0_7], %8 {strides = array<i32>} : memref<8x1024xbf16, #tpu.memory_space<vmem>>, vector<8x1024xbf16>,
    return
  }
  func.func @transform_0(%arg0: i32) -> (i32, i32) {
    %c0_i32 = arith.constant 0 : i32
    %c0_i32_0 = arith.constant 0 : i32
    return %c0_i32, %arg0 : i32, i32
  }
  func.func @transform_1(%arg0: i32) -> (i32, i32) {
    %c0_i32 = arith.constant 0 : i32
    %c0_i32_0 = arith.constant 0 : i32
    %c0_i32_1 = arith.constant 0 : i32
    return %c0_i32, %c0_i32_0 : i32, i32
  }
  func.func @transform_2(%arg0: i32) -> (i32, i32) {
    %c0_i32 = arith.constant 0 : i32
    %c0_i32_0 = arith.constant 0 : i32
    %c0_i32_1 = arith.constant 0 : i32
    return %c0_i32, %c0_i32_0 : i32, i32
  }
  func.func @transform_3(%arg0: i32) -> (i32, i32) {
    %c0_i32 = arith.constant 0 : i32
    %c0_i32_0 = arith.constant 0 : i32
    return %c0_i32, %arg0 : i32, i32
  }
}

</mosaic_0001>

<bundles_post_ra>
// kernel: conv3d_relu_pallas.1
= control target key start
LH: loop header
LB: loop body
LE: loop exit
PB: predicated region body
PF: predicated region fallthrough
CT: control target
= control target key end

     0   :  { %s1074_s12 = smov 0   ;;  %s1076_s13 = smov 0   ;;  %s1321_s0 = inlined_call_operand.vmem [shape: bf16[112,4096], index: 0, kind: input, shape index: {}]   ;;  %s1322_s1 = inlined_call_operand.vmem [shape: bf16[8,112], index: 1, kind: input, shape index: {}]   ;;  %s1323_s2 = inlined_call_operand.vmem [shape: f32[8,1], index: 2, kind: input, shape index: {}]   ;;  %s1324_s3 = inlined_call_operand.vmem [shape: bf16[8,4096], index: 3, kind: output, shape index: {}]  }
   0x1   :  { %s1078_s14 = smov 0  }
   0x2 LB: > { %s921_s15 = sadd.s32 4294967295, %s1051_s14   ;;  %s1091_s16 = sadd.s32 1, %s1051_s14   ;;  %s1051_s14 = sphi %s1078_s14, %s1327_s14   ;;  %s1047_s13 = sphi %s1076_s13, %s1326_s13   ;;  %s1043_s12 = sphi %s1074_s12, %s1325_s12  }
   0x3   : > { %s17_s17 = ssub.s32 %s1051_s14, %s1091_s16  ;;  %s20_s18 = sadd.s32 1, %s1047_s13 }
   0x4   : > { %p18_p0 = scmp.eq.s32.totalorder %s17_s17, 0  ;;  %p27_p1 = scmp.ne.s32.totalorder %s1047_s13, %s1043_s12 }
   0x5   : > { %p28_p2 = scmp.eq.s32.totalorder %s1051_s14, 0  ;;  %p924_p4 = scmp.ge.s32.totalorder %s1051_s14, 4 }
   0x6   : > { %s1100_s19 = scalar_select %p18_p0, %s1047_s13, %s20_s18  }
   0x7   : > { %p29_p3 = por %p28_p2, %p27_p1  ;;  %127 = sbr.rel (%p924_p4) target bundleno = 45 (0x2d), region = 24 }
   0xc   : > { %130 = sbr.rel (!%p29_p3) target bundleno = 45 (0x2d), region = 28  ;;  %s132_s20 = sand.u32 (%p29_p3), 1, %s1047_s13  }
   0xd   : > { %s996_s21 = sshll.u32 (%p29_p3), %s1051_s14, 5  ;;  %s1001_s22 = smul.u32 (%p29_p3), 448, %s132_s20 }
   0xe   : > { %s1108_s25 = scalar_lea.vmem (%p29_p3), %s1321_s0, %s996_s21 }
   0xf   : > { %v150_v0 = vld [vmem:[%s1108_s25] sm:$0xff] (%p29_p3)  ;;  %v152_v1 = vld [vmem:[%s1108_s25 + $0x8] sm:$0xff] (%p29_p3)  ;;  %v154_v2 = vld [vmem:[%s1108_s25 + $0x10] sm:$0xff] (%p29_p3)  ;;  %s1116_s26 = scalar_lea.vmem (%p29_p3), [#allocation2], %s1001_s22 }
  0x10   : > { %v156_v3 = vld [vmem:[%s1108_s25 + $0x18] sm:$0xff] (%p29_p3)  ;;  %v158_v4 = vld [vmem:[%s1108_s25 + $0x80] sm:$0xff] (%p29_p3)  ;;  %v160_v5 = vld [vmem:[%s1108_s25 + $0x88] sm:$0xff] (%p29_p3)  ;;  %151 = vst [vmem:[%s1116_s26] sm:$0xff] (%p29_p3), %v150_v0 }
  0x11   : > { %153 = vst [vmem:[%s1116_s26 + $0x8] sm:$0xff] %v152_v1  ;;  %155 = vst [vmem:[%s1116_s26 + $0x10] sm:$0xff] %v154_v2  ;;  %v162_v6 = vld [vmem:[%s1108_s25 + $0x90] sm:$0xff]  ;;  %v164_v7 = vld [vmem:[%s1108_s25 + $0x98] sm:$0xff] }
  0x12   : > { %157 = vst [vmem:[%s1116_s26 + $0x18] sm:$0xff] %v156_v3  ;;  %159 = vst [vmem:[%s1116_s26 + $0x20] sm:$0xff] %v158_v4  ;;  %v166_v8 = vld [vmem:[%s1108_s25 + $0x100] sm:$0xff]  ;;  %v168_v9 = vld [vmem:[%s1108_s25 + $0x108] sm:$0xff] }
  0x13   : > { %161 = vst [vmem:[%s1116_s26 + $0x28] sm:$0xff] %v160_v5  ;;  %163 = vst [vmem:[%s1116_s26 + $0x30] sm:$0xff] %v162_v6  ;;  %v170_v10 = vld [vmem:[%s1108_s25 + $0x110] sm:$0xff]  ;;  %v172_v11 = vld [vmem:[%s1108_s25 + $0x118] sm:$0xff] }
  0x14   : > { %165 = vst [vmem:[%s1116_s26 + $0x38] sm:$0xff] %v164_v7  ;;  %167 = vst [vmem:[%s1116_s26 + $0x40] sm:$0xff] %v166_v8  ;;  %v174_v12 = vld [vmem:[%s1108_s25 + $0x180] sm:$0xff]  ;;  %v176_v13 = vld [vmem:[%s1108_s25 + $0x188] sm:$0xff] }
  0x15   : > { %169 = vst [vmem:[%s1116_s26 + $0x48] sm:$0xff] %v168_v9  ;;  %171 = vst [vmem:[%s1116_s26 + $0x50] sm:$0xff] %v170_v10  ;;  %v178_v14 = vld [vmem:[%s1108_s25 + $0x190] sm:$0xff]  ;;  %v180_v15 = vld [vmem:[%s1108_s25 + $0x198] sm:$0xff] }
  0x16   : > { %173 = vst [vmem:[%s1116_s26 + $0x58] sm:$0xff] %v172_v11  ;;  %175 = vst [vmem:[%s1116_s26 + $0x60] sm:$0xff] %v174_v12  ;;  %v182_v16 = vld [vmem:[%s1108_s25 + $0x200] sm:$0xff]  ;;  %v184_v17 = vld [vmem:[%s1108_s25 + $0x208] sm:$0xff] }
  0x17   : > { %177 = vst [vmem:[%s1116_s26 + $0x68] sm:$0xff] %v176_v13  ;;  %179 = vst [vmem:[%s1116_s26 + $0x70] sm:$0xff] %v178_v14  ;;  %v186_v18 = vld [vmem:[%s1108_s25 + $0x210] sm:$0xff]  ;;  %v188_v19 = vld [vmem:[%s1108_s25 + $0x218] sm:$0xff] }
  0x18   : > { %181 = vst [vmem:[%s1116_s26 + $0x78] sm:$0xff] %v180_v15  ;;  %183 = vst [vmem:[%s1116_s26 + $0x80] sm:$0xff] %v182_v16  ;;  %v190_v20 = vld [vmem:[%s1108_s25 + $0x280] sm:$0xff]  ;;  %v192_v21 = vld [vmem:[%s1108_s25 + $0x288] sm:$0xff] }
  0x19   : > { %185 = vst [vmem:[%s1116_s26 + $0x88] sm:$0xff] %v184_v17  ;;  %187 = vst [vmem:[%s1116_s26 + $0x90] sm:$0xff] %v186_v18  ;;  %v194_v22 = vld [vmem:[%s1108_s25 + $0x290] sm:$0xff]  ;;  %v196_v23 = vld [vmem:[%s1108_s25 + $0x298] sm:$0xff] }
  0x1a   : > { %189 = vst [vmem:[%s1116_s26 + $0x98] sm:$0xff] %v188_v19  ;;  %191 = vst [vmem:[%s1116_s26 + $0xa0] sm:$0xff] %v190_v20  ;;  %v198_v24 = vld [vmem:[%s1108_s25 + $0x300] sm:$0xff]  ;;  %v200_v25 = vld [vmem:[%s1108_s25 + $0x308] sm:$0xff] }
  0x1b   : > { %193 = vst [vmem:[%s1116_s26 + $0xa8] sm:$0xff] %v192_v21  ;;  %195 = vst [vmem:[%s1116_s26 + $0xb0] sm:$0xff] %v194_v22  ;;  %v202_v26 = vld [vmem:[%s1108_s25 + $0x310] sm:$0xff]  ;;  %v204_v27 = vld [vmem:[%s1108_s25 + $0x318] sm:$0xff] }
  0x1c   : > { %197 = vst [vmem:[%s1116_s26 + $0xb8] sm:$0xff] %v196_v23  ;;  %199 = vst [vmem:[%s1116_s26 + $0xc0] sm:$0xff] %v198_v24  ;;  %v206_v28 = vld [vmem:[%s1108_s25 + $0x380] sm:$0xff]  ;;  %v208_v29 = vld [vmem:[%s1108_s25 + $0x388] sm:$0xff] }
  0x1d   : > { %201 = vst [vmem:[%s1116_s26 + $0xc8] sm:$0xff] %v200_v25  ;;  %203 = vst [vmem:[%s1116_s26 + $0xd0] sm:$0xff] %v202_v26  ;;  %v210_v30 = vld [vmem:[%s1108_s25 + $0x390] sm:$0xff]  ;;  %v212_v31 = vld [vmem:[%s1108_s25 + $0x398] sm:$0xff] }
  0x1e   : > { %205 = vst [vmem:[%s1116_s26 + $0xd8] sm:$0xff] %v204_v27  ;;  %207 = vst [vmem:[%s1116_s26 + $0xe0] sm:$0xff] %v206_v28  ;;  %v214_v32 = vld [vmem:[%s1108_s25 + $0x400] sm:$0xff]  ;;  %v216_v33 = vld [vmem:[%s1108_s25 + $0x408] sm:$0xff] }
  0x1f   : > { %209 = vst [vmem:[%s1116_s26 + $0xe8] sm:$0xff] %v208_v29  ;;  %211 = vst [vmem:[%s1116_s26 + $0xf0] sm:$0xff] %v210_v30  ;;  %v218_v34 = vld [vmem:[%s1108_s25 + $0x410] sm:$0xff]  ;;  %v220_v35 = vld [vmem:[%s1108_s25 + $0x418] sm:$0xff] }
  0x20   : > { %213 = vst [vmem:[%s1116_s26 + $0xf8] sm:$0xff] %v212_v31  ;;  %215 = vst [vmem:[%s1116_s26 + $0x100] sm:$0xff] %v214_v32  ;;  %v222_v36 = vld [vmem:[%s1108_s25 + $0x480] sm:$0xff]  ;;  %v224_v37 = vld [vmem:[%s1108_s25 + $0x488] sm:$0xff] }
  0x21   : > { %217 = vst [vmem:[%s1116_s26 + $0x108] sm:$0xff] %v216_v33  ;;  %219 = vst [vmem:[%s1116_s26 + $0x110] sm:$0xff] %v218_v34  ;;  %v226_v38 = vld [vmem:[%s1108_s25 + $0x490] sm:$0xff]  ;;  %v228_v39 = vld [vmem:[%s1108_s25 + $0x498] sm:$0xff] }
  0x22   : > { %221 = vst [vmem:[%s1116_s26 + $0x118] sm:$0xff] %v220_v35  ;;  %223 = vst [vmem:[%s1116_s26 + $0x120] sm:$0xff] %v222_v36  ;;  %v230_v40 = vld [vmem:[%s1108_s25 + $0x500] sm:$0xff]  ;;  %v232_v41 = vld [vmem:[%s1108_s25 + $0x508] sm:$0xff] }
  0x23   : > { %225 = vst [vmem:[%s1116_s26 + $0x128] sm:$0xff] %v224_v37  ;;  %227 = vst [vmem:[%s1116_s26 + $0x130] sm:$0xff] %v226_v38  ;;  %v234_v42 = vld [vmem:[%s1108_s25 + $0x510] sm:$0xff]  ;;  %v236_v43 = vld [vmem:[%s1108_s25 + $0x518] sm:$0xff] }
  0x24   : > { %229 = vst [vmem:[%s1116_s26 + $0x138] sm:$0xff] %v228_v39  ;;  %231 = vst [vmem:[%s1116_s26 + $0x140] sm:$0xff] %v230_v40  ;;  %v238_v44 = vld [vmem:[%s1108_s25 + $0x580] sm:$0xff]  ;;  %v240_v45 = vld [vmem:[%s1108_s25 + $0x588] sm:$0xff] }
  0x25   : > { %233 = vst [vmem:[%s1116_s26 + $0x148] sm:$0xff] %v232_v41  ;;  %235 = vst [vmem:[%s1116_s26 + $0x150] sm:$0xff] %v234_v42  ;;  %v242_v46 = vld [vmem:[%s1108_s25 + $0x590] sm:$0xff]  ;;  %v244_v47 = vld [vmem:[%s1108_s25 + $0x598] sm:$0xff] }
  0x26   : > { %237 = vst [vmem:[%s1116_s26 + $0x158] sm:$0xff] %v236_v43  ;;  %239 = vst [vmem:[%s1116_s26 + $0x160] sm:$0xff] %v238_v44  ;;  %v246_v48 = vld [vmem:[%s1108_s25 + $0x600] sm:$0xff]  ;;  %v248_v49 = vld [vmem:[%s1108_s25 + $0x608] sm:$0xff] }
  0x27   : > { %241 = vst [vmem:[%s1116_s26 + $0x168] sm:$0xff] %v240_v45  ;;  %243 = vst [vmem:[%s1116_s26 + $0x170] sm:$0xff] %v242_v46  ;;  %v250_v50 = vld [vmem:[%s1108_s25 + $0x610] sm:$0xff]  ;;  %v252_v51 = vld [vmem:[%s1108_s25 + $0x618] sm:$0xff] }
  0x28   : > { %245 = vst [vmem:[%s1116_s26 + $0x178] sm:$0xff] %v244_v47  ;;  %247 = vst [vmem:[%s1116_s26 + $0x180] sm:$0xff] %v246_v48  ;;  %v254_v52 = vld [vmem:[%s1108_s25 + $0x680] sm:$0xff]  ;;  %v256_v53 = vld [vmem:[%s1108_s25 + $0x688] sm:$0xff] }
  0x29   : > { %249 = vst [vmem:[%s1116_s26 + $0x188] sm:$0xff] %v248_v49  ;;  %251 = vst [vmem:[%s1116_s26 + $0x190] sm:$0xff] %v250_v50  ;;  %v258_v54 = vld [vmem:[%s1108_s25 + $0x690] sm:$0xff]  ;;  %v260_v55 = vld [vmem:[%s1108_s25 + $0x698] sm:$0xff] }
  0x2a   : > { %253 = vst [vmem:[%s1116_s26 + $0x198] sm:$0xff] %v252_v51  ;;  %255 = vst [vmem:[%s1116_s26 + $0x1a0] sm:$0xff] %v254_v52 }
  0x2b   : > { %257 = vst [vmem:[%s1116_s26 + $0x1a8] sm:$0xff] %v256_v53  ;;  %259 = vst [vmem:[%s1116_s26 + $0x1b0] sm:$0xff] %v258_v54 }
  0x2c   : > { %261 = vst [vmem:[%s1116_s26 + $0x1b8] sm:$0xff] %v260_v55 }
  0x2d PF: > { %p927_p5 = scmp.ge.s32.totalorder %s1051_s14, 1  ;;  %p266_p6 = scmp.lt.s32.totalorder %s1051_s14, 5 }
  0x2f   : > { %p267_p7 = pnand %p927_p5, %p266_p6 }
  0x30   : > { %s273_s27 = sand.u32 (!%p267_p7), 1, %s1043_s12   ;;  %s928_s7 = sshll.u32 (!%p267_p7), %s921_s15, 3 }
  0x31   : > { %270 = sbr.rel (%p267_p7) target bundleno = 317 (0x13d), region = 51  ;;  %p298_p8 = scmp.lt.s32.totalorder (!%p267_p7), %s928_s7, 31 }
  0x32   : > { %s1002_s30 = smul.u32 (!%p267_p7), 448, %s273_s27 }
  0x34   : > { %s1233_s4 = scalar_lea.vmem (!%p267_p7), [#allocation2], %s1002_s30 }
  0x36   : > { %v361_v56 = vld [vmem:[%s1323_s2] sm:$0xff]  ;;  %v1053_v57 = vmov 0   ;;  %v354_v60 = vld [vmem:[%s1233_s4 + $0x188] sm:$0xff]  ;;  %v355_v48 = vld [vmem:[%s1233_s4 + $0x190] sm:$0xff]  ;;  %vm647_vm0 = vcmask 916480   ;;  %s1329_s7 = smov (!%p298_p8, %s928_s7), 31 }
  0x37   : > { %683 = vmatprep.mubr.bf16.mxu0 %v1053_v57  ;;  %724 = vmatprep.mubr.bf16.mxu1 %v1053_v57  ;;  %v353_v58 = vld [vmem:[%s1233_s4 + $0x180] sm:$0xff]  ;;  %v358_v62 = vld [vmem:[%s1233_s4 + $0x1a8] sm:$0xff]  ;;  %v359_v49 = vld [vmem:[%s1233_s4 + $0x1b0] sm:$0xff]  ;;  %s929_s8 = sshll.u32 %s1329_s7, 2 }
  0x38   : > { %1028 = vset.pattern.permute.xlu0 %v1053_v57  ;;  %v357_v59 = vld [vmem:[%s1233_s4 + $0x1a0] sm:$0xff]  ;;  %v981_v2 = vcombine.high %v354_v60, %v358_v62  ;;  %v980_v3 = vcombine.low %v354_v60, %v358_v62  ;;  %v346_v5 = vld [vmem:[%s1233_s4 + $0x148] sm:$0xff]  ;;  %v356_v50 = vld [vmem:[%s1233_s4 + $0x198] sm:$0xff]  ;;  %v983_v54 = vcombine.high %v355_v48, %v359_v49  ;;  %v982_v62 = vcombine.low %v355_v48, %v359_v49  ;;  %s301_s11 = scalar_lea.vmem %s1324_s3, %s929_s8 }
  0x39   : > { %364 = vperm.xlu0 %1028, %v361_v56   ;;  %v979_v61 = vcombine.high %v353_v58, %v357_v59  ;;  %v978_v63 = vcombine.low %v353_v58, %v357_v59  ;;  %v345_v0 = vld [vmem:[%s1233_s4 + $0x140] sm:$0xff]  ;;  %v350_v6 = vld [vmem:[%s1233_s4 + $0x168] sm:$0xff]  ;;  %v360_v51 = vld [vmem:[%s1233_s4 + $0x1b8] sm:$0xff] }
  0x3a   : > { %v349_v1 = vld [vmem:[%s1233_s4 + $0x160] sm:$0xff]  ;;  %v973_v8 = vcombine.high %v346_v5, %v350_v6  ;;  %v338_v10 = vld [vmem:[%s1233_s4 + $0x108] sm:$0xff]  ;;  %694 = vmatprep.subr.bf16.mxu1 %v981_v2  ;;  %v972_v13 = vcombine.low %v346_v5, %v350_v6  ;;  %v985_v55 = vcombine.high %v356_v50, %v360_v51  ;;  %v347_v56 = vld [vmem:[%s1233_s4 + $0x150] sm:$0xff] }
  0x3b   : > { %v971_v4 = vcombine.high %v345_v0, %v349_v1  ;;  %v337_v7 = vld [vmem:[%s1233_s4 + $0x100] sm:$0xff]  ;;  %653 = vmatprep.subr.bf16.mxu0 %v979_v61  ;;  %v342_v11 = vld [vmem:[%s1233_s4 + $0x128] sm:$0xff]  ;;  %v970_v12 = vcombine.low %v345_v0, %v349_v1  ;;  %695 = vmatpush1.bf16.msra.mxu1 %v980_v3  ;;  %v351_v58 = vld [vmem:[%s1233_s4 + $0x170] sm:$0xff] }
  0x3c   : > { %v341_v9 = vld [vmem:[%s1233_s4 + $0x120] sm:$0xff]  ;;  %654 = vmatpush1.bf16.msra.mxu0 %v978_v63  ;;  %696 = vmatprep.subr.bf16.mxu1 %v973_v8  ;;  %v965_v15 = vcombine.high %v338_v10, %v342_v11  ;;  %v330_v18 = vld [vmem:[%s1233_s4 + $0xc8] sm:$0xff]  ;;  %v964_v21 = vcombine.low %v338_v10, %v342_v11  ;;  %v348_v59 = vld [vmem:[%s1233_s4 + $0x158] sm:$0xff]  ;;  %v984_v63 = vcombine.low %v356_v50, %v360_v51 }
  0x3d   : > { %655 = vmatprep.subr.bf16.mxu0 %v971_v4  ;;  %v963_v14 = vcombine.high %v337_v7, %v341_v9  ;;  %v329_v16 = vld [vmem:[%s1233_s4 + $0xc0] sm:$0xff]  ;;  %v334_v19 = vld [vmem:[%s1233_s4 + $0xe8] sm:$0xff]  ;;  %v962_v20 = vcombine.low %v337_v7, %v341_v9  ;;  %v352_v60 = vld [vmem:[%s1233_s4 + $0x178] sm:$0xff]  ;;  %v975_v0 = vcombine.high %v347_v56, %v351_v58  ;;  %v974_v6 = vcombine.low %v347_v56, %v351_v58 }
  0x3e   : > { %v333_v17 = vld [vmem:[%s1233_s4 + $0xe0] sm:$0xff]  ;;  %v957_v23 = vcombine.high %v330_v18, %v334_v19  ;;  %v322_v26 = vld [vmem:[%s1233_s4 + $0x88] sm:$0xff]  ;;  %v956_v29 = vcombine.low %v330_v18, %v334_v19  ;;  %v977_v1 = vcombine.high %v348_v59, %v352_v60  ;;  %v339_v2 = vld [vmem:[%s1233_s4 + $0x110] sm:$0xff]  ;;  %v976_v7 = vcombine.low %v348_v59, %v352_v60 }
  0x3f   : > { %697 = vmatpush1.bf16.msra.mxu1 %v972_v13  ;;  %v955_v22 = vcombine.high %v329_v16, %v333_v17  ;;  %v321_v24 = vld [vmem:[%s1233_s4 + $0x80] sm:$0xff]  ;;  %v326_v27 = vld [vmem:[%s1233_s4 + $0xa8] sm:$0xff]  ;;  %v954_v28 = vcombine.low %v329_v16, %v333_v17  ;;  %v343_v3 = vld [vmem:[%s1233_s4 + $0x130] sm:$0xff] }
  0x40   : > { %656 = vmatpush1.bf16.msra.mxu0 %v970_v12  ;;  %698 = vmatprep.subr.bf16.mxu1 %v965_v15  ;;  %v325_v25 = vld [vmem:[%s1233_s4 + $0xa0] sm:$0xff]  ;;  %v949_v31 = vcombine.high %v322_v26, %v326_v27  ;;  %v314_v34 = vld [vmem:[%s1233_s4 + $0x48] sm:$0xff]  ;;  %v948_v37 = vcombine.low %v322_v26, %v326_v27  ;;  %v340_v4 = vld [vmem:[%s1233_s4 + $0x118] sm:$0xff]  ;;  %v967_v8 = vcombine.high %v339_v2, %v343_v3 }
  0x41   : > { %657 = vmatprep.subr.bf16.mxu0 %v963_v14  ;;  %v947_v30 = vcombine.high %v321_v24, %v325_v25  ;;  %v313_v32 = vld [vmem:[%s1233_s4 + $0x40] sm:$0xff]  ;;  %v318_v35 = vld [vmem:[%s1233_s4 + $0x68] sm:$0xff]  ;;  %v946_v36 = vcombine.low %v321_v24, %v325_v25  ;;  %v344_v5 = vld [vmem:[%s1233_s4 + $0x138] sm:$0xff]  ;;  %v966_v14 = vcombine.low %v339_v2, %v343_v3 }
  0x42   : > { %v317_v33 = vld [vmem:[%s1233_s4 + $0x60] sm:$0xff]  ;;  %v941_v39 = vcombine.high %v314_v34, %v318_v35  ;;  %v306_v42 = vld [vmem:[%s1233_s4 + $0x8] sm:$0xff]  ;;  %v940_v45 = vcombine.low %v314_v34, %v318_v35  ;;  %v969_v9 = vcombine.high %v340_v4, %v344_v5  ;;  %v331_v10 = vld [vmem:[%s1233_s4 + $0xd0] sm:$0xff]  ;;  %v968_v15 = vcombine.low %v340_v4, %v344_v5 }
  0x43   : > { %699 = vmatpush1.bf16.msra.mxu1 %v964_v21  ;;  %v939_v38 = vcombine.high %v313_v32, %v317_v33  ;;  %v305_v40 = vld [vmem:[%s1233_s4] sm:$0xff]  ;;  %v310_v43 = vld [vmem:[%s1233_s4 + $0x28] sm:$0xff]  ;;  %v938_v44 = vcombine.low %v313_v32, %v317_v33  ;;  %v335_v11 = vld [vmem:[%s1233_s4 + $0xf0] sm:$0xff] }
  0x44   : > { %658 = vmatpush1.bf16.msra.mxu0 %v962_v20  ;;  %700 = vmatprep.subr.bf16.mxu1 %v957_v23  ;;  %v309_v41 = vld [vmem:[%s1233_s4 + $0x20] sm:$0xff]  ;;  %v933_v47 = vcombine.high %v306_v42, %v310_v43  ;;  %v932_v53 = vcombine.low %v306_v42, %v310_v43  ;;  %v332_v12 = vld [vmem:[%s1233_s4 + $0xd8] sm:$0xff]  ;;  %v959_v16 = vcombine.high %v331_v10, %v335_v11  ;;  %v323_v18 = vld [vmem:[%s1233_s4 + $0x90] sm:$0xff] }
  0x45   : > { %659 = vmatprep.subr.bf16.mxu0 %v955_v22  ;;  %v931_v46 = vcombine.high %v305_v40, %v309_v41  ;;  %v930_v52 = vcombine.low %v305_v40, %v309_v41  ;;  %v1274_v61 = vld [vmem:[%s1322_s1] sm:$0xf]  ;;  %v336_v13 = vld [vmem:[%s1233_s4 + $0xf8] sm:$0xff]  ;;  %v327_v19 = vld [vmem:[%s1233_s4 + $0xb0] sm:$0xff]  ;;  %v958_v22 = vcombine.low %v331_v10, %v335_v11 }
  0x46   : > { %v961_v17 = vcombine.high %v332_v12, %v336_v13  ;;  %v324_v20 = vld [vmem:[%s1233_s4 + $0x98] sm:$0xff]  ;;  %v951_v23 = vcombine.high %v323_v18, %v327_v19  ;;  %v315_v25 = vld [vmem:[%s1233_s4 + $0x50] sm:$0xff] }
  0x47   : > { %701 = vmatpush1.bf16.msra.mxu1 %v956_v29  ;;  %v328_v21 = vld [vmem:[%s1233_s4 + $0xb8] sm:$0xff]  ;;  %v319_v26 = vld [vmem:[%s1233_s4 + $0x70] sm:$0xff]  ;;  %v950_v29 = vcombine.low %v323_v18, %v327_v19 }
  0x48   : > { %660 = vmatpush1.bf16.msra.mxu0 %v954_v28  ;;  %702 = vmatprep.subr.bf16.mxu1 %v949_v31  ;;  %v953_v24 = vcombine.high %v324_v20, %v328_v21  ;;  %v316_v27 = vld [vmem:[%s1233_s4 + $0x58] sm:$0xff]  ;;  %v943_v31 = vcombine.high %v315_v25, %v319_v26  ;;  %v307_v33 = vld [vmem:[%s1233_s4 + $0x10] sm:$0xff] }
  0x49   : > { %661 = vmatprep.subr.bf16.mxu0 %v947_v30  ;;  %v320_v28 = vld [vmem:[%s1233_s4 + $0x78] sm:$0xff]  ;;  %v952_v30 = vcombine.low %v324_v20, %v328_v21  ;;  %v311_v34 = vld [vmem:[%s1233_s4 + $0x30] sm:$0xff] }
  0x4a   : > { %v945_v32 = vcombine.high %v316_v27, %v320_v28  ;;  %v308_v35 = vld [vmem:[%s1233_s4 + $0x18] sm:$0xff]  ;;  %v934_v41 = vcombine.low %v307_v33, %v311_v34 }
  0x4b   : > { %703 = vmatpush1.bf16.msra.mxu1 %v948_v37  ;;  %v942_v37 = vcombine.low %v315_v25, %v319_v26 }
  0x4c   : > { %662 = vmatpush1.bf16.msra.mxu0 %v946_v36  ;;  %704 = vmatprep.subr.bf16.mxu1 %v941_v39  ;;  %v312_v36 = vld [vmem:[%s1233_s4 + $0x38] sm:$0xff]  ;;  %v935_v39 = vcombine.high %v307_v33, %v311_v34 }
  0x4d   : > { %663 = vmatprep.subr.bf16.mxu0 %v939_v38  ;;  %v944_v38 = vcombine.low %v316_v27, %v320_v28  ;;  %v937_v40 = vcombine.high %v308_v35, %v312_v36  ;;  %v936_v42 = vcombine.low %v308_v35, %v312_v36 }
  0x4f   : > { %705 = vmatpush1.bf16.msra.mxu1 %v940_v45 }
  0x50   : > { %664 = vmatpush1.bf16.msra.mxu0 %v938_v44  ;;  %706 = vmatprep.subr.bf16.mxu1 %v933_v47 }
  0x51   : > { %665 = vmatprep.subr.bf16.mxu0 %v931_v46 }
  0x53   : > { %707 = vmatpush1.bf16.msra.mxu1 %v932_v53 }
  0x54   : > { %666 = vmatpush1.bf16.msra.mxu0 %v930_v52  ;;  %776 = vmatprep.subr.bf16.mxu1 %v985_v55 }
  0x55   : > { %735 = vmatprep.subr.bf16.mxu0 %v983_v54 }
  0x56   : > { %987 = vmatmul.mubr.msk.bf16.vlgmr.msra.gmra.mxu1 %vm647_vm0, %v1274_v61 }
  0x57   : > { %986 = vmatmul.mubr.msk.bf16.vlgmr.msra.gmra.mxu0 %vm647_vm0, %v1274_v61  ;;  %777 = vmatpush1.bf16.msra.mxu1 %v984_v63 }
  0x58   : > { %736 = vmatpush1.bf16.msra.mxu0 %v982_v62  ;;  %778 = vmatprep.subr.bf16.mxu1 %v977_v1 }
  0x59   : > { %737 = vmatprep.subr.bf16.mxu0 %v975_v0  ;;  %765 = vmatprep.mubr.bf16.mxu0 %v1053_v57 }
  0x5a   : > { %806 = vmatprep.mubr.bf16.mxu1 %v1053_v57  ;;  %v960_v57 = vcombine.low %v332_v12, %v336_v13 }
  0x5b   : > { %779 = vmatpush1.bf16.msra.mxu1 %v976_v7 }
  0x5c   : > { %738 = vmatpush1.bf16.msra.mxu0 %v974_v6  ;;  %780 = vmatprep.subr.bf16.mxu1 %v969_v9 }
  0x5d   : > { %739 = vmatprep.subr.bf16.mxu0 %v967_v8 }
  0x5f   : > { %781 = vmatpush1.bf16.msra.mxu1 %v968_v15 }
  0x60   : > { %740 = vmatpush1.bf16.msra.mxu0 %v966_v14  ;;  %782 = vmatprep.subr.bf16.mxu1 %v961_v17 }
  0x61   : > { %741 = vmatprep.subr.bf16.mxu0 %v959_v16 }
  0x63   : > { %783 = vmatpush1.bf16.msra.mxu1 %v960_v57 }
  0x64   : > { %742 = vmatpush1.bf16.msra.mxu0 %v958_v22  ;;  %784 = vmatprep.subr.bf16.mxu1 %v953_v24 }
  0x65   : > { %743 = vmatprep.subr.bf16.mxu0 %v951_v23 }
  0x67   : > { %785 = vmatpush1.bf16.msra.mxu1 %v952_v30 }
  0x68   : > { %744 = vmatpush1.bf16.msra.mxu0 %v950_v29  ;;  %786 = vmatprep.subr.bf16.mxu1 %v945_v32 }
  0x69   : > { %745 = vmatprep.subr.bf16.mxu0 %v943_v31 }
  0x6b   : > { %787 = vmatpush1.bf16.msra.mxu1 %v944_v38 }
  0x6c   : > { %746 = vmatpush1.bf16.msra.mxu0 %v942_v37  ;;  %788 = vmatprep.subr.bf16.mxu1 %v937_v40 }
  0x6d   : > { %747 = vmatprep.subr.bf16.mxu0 %v935_v39 }
  0x6f   : > { %789 = vmatpush1.bf16.msra.mxu1 %v936_v42 }
  0x70   : > { %748 = vmatpush1.bf16.msra.mxu0 %v934_v41 }
  0x72   : > { %989 = vmatmul.mubr.msk.bf16.vlgmr.msra.gmra.mxu1 %vm647_vm0, %v1274_v61 }
  0x73   : > { %988 = vmatmul.mubr.msk.bf16.vlgmr.msra.gmra.mxu0 %vm647_vm0, %v1274_v61 }
  0xb4   : > { %v365_v43 = vpop.permute.xlu0 %364 }
 0x116   : > { %v726_v45 = vpop.f32.mrf.mxu1 }
 0x117   : > { %v685_v44 = vpop.f32.mrf.mxu0  ;;  %v727_v48 = vadd.f32 %v726_v45, %v365_v43 }
 0x118   : > { %v686_v46 = vadd.f32 %v685_v44, %v365_v43  ;;  %v728_v51 = vpop.f32.mrf.mxu1 }
 0x119   : > { %v687_v47 = vpop.f32.mrf.mxu0  ;;  %v729_v52 = vadd.f32 %v728_v51, %v365_v43  ;;  %v817_v53 = vmax.f32 %v727_v48, 0.0 }
 0x11a   : > { %v688_v49 = vadd.f32 %v687_v47, %v365_v43  ;;  %v815_v50 = vmax.f32 %v686_v46, 0.0  ;;  %v730_v56 = vpop.f32.mrf.mxu1 }
 0x11b   : > { %v689_v54 = vpop.f32.mrf.mxu0  ;;  %v818_v58 = vmax.f32 %v729_v52, 0.0 }
 0x11c   : > { %v816_v55 = vmax.f32 %v688_v49, 0.0  ;;  %v731_v61 = vpop.f32.mrf.mxu1 }
 0x11d   : > { %v690_v59 = vpop.f32.mrf.mxu0  ;;  %v998_v62 = vpack.c.bf16 %v818_v58, %v817_v53 }
 0x11e   : > { %v997_v60 = vpack.c.bf16 %v816_v55, %v815_v50 }
 0x11f   : > { %856 = vst [vmem:[%s301_s11 + $0x8] sm:$0xff] %v998_v62 }
 0x120   : > { %855 = vst [vmem:[%s301_s11] sm:$0xff] %v997_v60 }
 0x132   : > { %v808_v1 = vpop.f32.mrf.mxu1 }
 0x133   : > { %v767_v63 = vpop.f32.mrf.mxu0  ;;  %v809_v2 = vadd.f32 %v808_v1, %v365_v43 }
 0x134   : > { %v768_v0 = vadd.f32 %v767_v63, %v365_v43  ;;  %v810_v5 = vpop.f32.mrf.mxu1 }
 0x135   : > { %v769_v3 = vpop.f32.mrf.mxu0  ;;  %v811_v6 = vadd.f32 %v810_v5, %v365_v43  ;;  %v821_v11 = vmax.f32 %v809_v2, 0.0 }
 0x136   : > { %v770_v4 = vadd.f32 %v769_v3, %v365_v43  ;;  %v819_v8 = vmax.f32 %v768_v0, 0.0  ;;  %v812_v10 = vpop.f32.mrf.mxu1 }
 0x137   : > { %v771_v7 = vpop.f32.mrf.mxu0  ;;  %v822_v12 = vmax.f32 %v811_v6, 0.0 }
 0x138   : > { %v820_v9 = vmax.f32 %v770_v4, 0.0  ;;  %v813_v15 = vpop.f32.mrf.mxu1 }
 0x139   : > { %v772_v13 = vpop.f32.mrf.mxu0  ;;  %v1000_v16 = vpack.c.bf16 %v822_v12, %v821_v11 }
 0x13a   : > { %v999_v14 = vpack.c.bf16 %v820_v9, %v819_v8 }
 0x13b   : > { %858 = vst [vmem:[%s301_s11 + $0x18] sm:$0xff] %v1000_v16 }
 0x13c   : > { %857 = vst [vmem:[%s301_s11 + $0x10] sm:$0xff] %v999_v14 }
 0x13d PF: > { %p10_p9 = scmp.ge.s32.totalorder %s1091_s16, 6   ;;  %s1325_s12 = smov %s1047_s13 }
 0x13e   : > { %s1326_s13 = smov %s1100_s19  ;;  %s1327_s14 = smov %s1091_s16 }
 0x13f   :  { %12 = sbr.rel (!%p10_p9) target bundleno = 2 (0x2), region = 90 }

</bundles_post_ra>
